<compile_context>
chip_gen: v7x
topology: tpu7x:2x2x1
jax: 0.10.0
libtpu: 0.0.40
codegen_flags: <defaults>
</compile_context>

<pallas_src>
import jax
import jax.numpy as jnp
from jax.experimental import pallas as pl
from jax.experimental.pallas import tpu as pltpu


def _right_ramp_kernel(p_ref, x_ref, o_ref):
    # p_ref: SMEM (2,) f32 -> [center, 1/radius]
    center = p_ref[0]
    inv_radius = p_ref[1]
    x = x_ref[...].astype(jnp.float32)
    y = jnp.clip((x - center) * inv_radius, -1.0, 0.0) + 1.0
    o_ref[...] = y.astype(o_ref.dtype)


def _tpu_block_config():
    """Generation-aware (block_target_bytes, vmem_limit_bytes|None, min_parallel_steps)."""
    kind = ""
    try:
        kind = jax.devices()[0].device_kind.lower()
    except Exception:
        pass
    if "v6" in kind:
        # v6e: 4 MiB x (in + out) x 2 buffers = 16 MiB < 32 MiB scoped-VMEM default.
        return 4 * 1024 * 1024, None, 1
    if "7" in kind:
        # v7x: ~3.2 TB/s HBM per TC -> bigger blocks to amortize per-step overhead.
        # 8 MiB x 4 buffers = 32 MiB needs an explicit scoped-VMEM raise (64 MiB phys).
        # 2 TCs/chip -> keep >=4 grid steps so the "parallel" axis actually splits.
        return 8 * 1024 * 1024, 48 * 1024 * 1024, 4
    # v5e and unknown chips: 2 MiB x 4 buffers = 8 MiB fits the 16 MiB scoped default.
    return 2 * 1024 * 1024, None, 1


def _right_ramp_2d(x2d: jax.Array, params: jax.Array, out_dtype) -> jax.Array:
    """Runs the kernel on a lane-dense (rows, lane) view; lane is a multiple of 128."""
    rows, lane = x2d.shape
    itemsize = jnp.dtype(x2d.dtype).itemsize
    # Packed-sublane multiple: 8 for 32-bit, 16 for 16-bit, 32 for 8-bit dtypes.
    sub = 8 * max(1, 4 // itemsize)

    target_bytes, vmem_limit, min_steps = _tpu_block_config()

    if rows <= sub:
        block_rows = rows  # full-extent first dim is always legal
    else:
        block_rows = max(
            sub,
            min((target_bytes // (lane * itemsize)) // sub * sub, (rows // sub) * sub),
        )
        if min_steps > 1 and rows * lane * itemsize >= 4 * 1024 * 1024:
            # v7x: guarantee enough grid steps for both TensorCores.
            while pl.cdiv(rows, block_rows) < min_steps and block_rows > sub:
                block_rows = max(sub, (block_rows // 2) // sub * sub)

    grid = (pl.cdiv(rows, block_rows),)

    cp_kwargs = dict(dimension_semantics=("parallel",))
    if vmem_limit is not None:
        cp_kwargs["vmem_limit_bytes"] = vmem_limit

    return pl.pallas_call(
        _right_ramp_kernel,
        out_shape=jax.ShapeDtypeStruct((rows, lane), out_dtype),
        grid=grid,
        in_specs=[
            pl.BlockSpec(memory_space=pltpu.MemorySpace.SMEM),  # (center, 1/radius)
            pl.BlockSpec((block_rows, lane), lambda i: (i, 0)),
        ],
        out_specs=pl.BlockSpec((block_rows, lane), lambda i: (i, 0)),
        compiler_params=pltpu.CompilerParams(**cp_kwargs),
    )(params, x2d)


def right_ramp_memb_f(x: jax.Array, radius: float, center: float) -> jax.Array:
    """Applies the right-ramp membership function elementwise (any-shaped float input)."""
    orig_shape = x.shape
    dtype = x.dtype
    total = int(x.size)
    if total == 0:
        return x

    # Runtime SMEM scalars -> one compiled kernel per (shape, dtype), not per params.
    inv_radius = 1.0 / float(radius)
    params = jnp.array([float(center), inv_radius], dtype=jnp.float32)

    flat = x.reshape(total)

    # Largest lane-dense last dim that divides the element count.
    lane = next((c for c in (512, 256, 128) if total % c == 0), None)
    if lane is not None:
        out2d = _right_ramp_2d(flat.reshape(total // lane, lane), params, dtype)
        return out2d.reshape(orig_shape)

    # Ragged element count: kernel on the 128-aligned bulk, tiny tail (<128 elems)
    # with plain jnp.  (Only hit for sizes not divisible by 128; avoids the old
    # full-array pad pass.)
    bulk = (total // 128) * 128
    tail = flat[bulk:]
    tail_out = (
        jnp.clip((tail.astype(jnp.float32) - params[0]) * params[1], -1.0, 0.0) + 1.0
    ).astype(dtype)
    if bulk == 0:
        # TODO(synk): inputs with fewer than 128 elements are handled in plain jnp;
        # a TPU kernel launch would be pure overhead at this size.
        return tail_out.reshape(orig_shape)

    bulk_lane = next(c for c in (512, 256, 128) if bulk % c == 0)
    bulk_out = _right_ramp_2d(
        flat[:bulk].reshape(bulk // bulk_lane, bulk_lane), params, dtype
    )
    return jnp.concatenate([bulk_out.reshape(bulk), tail_out]).reshape(orig_shape)


def _reference(x, radius, center):
    y = (x - center) / radius
    y = jnp.clip(y, -1.0, 0.0)
    return 1.0 + y


if __name__ == "__main__":
    # Deterministic "parameters" for the module (radius, center).
    radius = 2.0
    center = 0.5

    key = jax.random.PRNGKey(0)
    x = jax.random.normal(key, (2, 4, 16, 16), dtype=jnp.float32) * 3.0

    out = right_ramp_memb_f(x, radius=radius, center=center)
    out = jax.block_until_ready(out)

    ref = _reference(x, radius, center)
    assert out.shape == x.shape
    assert out.dtype == x.dtype
    assert jnp.allclose(out, ref, atol=1e-6, rtol=1e-6), "mismatch vs reference"

    # Exercise the ragged (non-128-divisible) bulk + tail path.
    x2 = jax.random.normal(jax.random.PRNGKey(0), (5, 131), dtype=jnp.float32) * 3.0
    out2 = jax.block_until_ready(right_ramp_memb_f(x2, radius=radius, center=center))
    ref2 = _reference(x2, radius, center)
    assert out2.shape == x2.shape and out2.dtype == x2.dtype
    assert jnp.allclose(out2, ref2, atol=1e-6, rtol=1e-6), "mismatch vs reference (ragged)"

    print("KERNEL_OK")
</pallas_src>

<mosaic_0001>
module attributes {stable_mosaic.version = 11 : i64} {
  func.func @_right_ramp_kernel(%arg0: i32, %arg1: memref<2xf32, #tpu.memory_space<smem>>, %arg2: memref<4x512xf32, #tpu.memory_space<vmem>>, %arg3: memref<4x512xf32, #tpu.memory_space<vmem>>) attributes {dimension_semantics = [#tpu.dimension_semantics<parallel>], iteration_bounds = array<i64: 1>, scalar_prefetch = 0 : i64, scratch_operands = 0 : i64, tpu.core_type = #tpu.core_type<tc>, window_params = [{transform_indices = @transform_0, window_bounds = array<i64: 2>}, {transform_indices = @transform_1, window_bounds = array<i64: 4, 512>}, {transform_indices = @transform_2, window_bounds = array<i64: 4, 512>}]} {
    %c0 = arith.constant 0 : index
    %0 = memref.load %arg1[%c0] : memref<2xf32, #tpu.memory_space<smem>>
    %c1 = arith.constant 1 : index
    %1 = memref.load %arg1[%c1] : memref<2xf32, #tpu.memory_space<smem>>
    %c0_0 = arith.constant 0 : index
    %c0_1 = arith.constant 0 : index
    %2 = vector.load %arg2[%c0_0, %c0_1] : memref<4x512xf32, #tpu.memory_space<vmem>>, vector<4x512xf32>
    %3 = vector.broadcast %0 : f32 to vector<4x512xf32>
    %4 = arith.subf %2, %3 : vector<4x512xf32>
    %5 = vector.broadcast %1 : f32 to vector<4x512xf32>
    %6 = arith.mulf %4, %5 : vector<4x512xf32>
    %cst = arith.constant -1.000000e+00 : f32
    %cst_2 = arith.constant 0.000000e+00 : f32
    %7 = vector.broadcast %cst : f32 to vector<4x512xf32>
    %8 = arith.maximumf %7, %6 : vector<4x512xf32>
    %9 = vector.broadcast %cst_2 : f32 to vector<4x512xf32>
    %10 = arith.minimumf %9, %8 : vector<4x512xf32>
    %cst_3 = arith.constant 1.000000e+00 : f32
    %11 = vector.broadcast %cst_3 : f32 to vector<4x512xf32>
    %12 = arith.addf %10, %11 : vector<4x512xf32>
    %c0_4 = arith.constant 0 : index
    %c0_5 = arith.constant 0 : index
    %13 = vector.load %arg3[%c0_4, %c0_5] : memref<4x512xf32, #tpu.memory_space<vmem>>, vector<4x512xf32>
    tpu.vector_store %arg3[%c0_4, %c0_5], %12 {strides = array<i32>} : memref<4x512xf32, #tpu.memory_space<vmem>>, vector<4x512xf32>,
    return
  }
  func.func @transform_0(%arg0: i32) -> i32 {
    %c0_i32 = arith.constant 0 : i32
    %c0_i32_0 = arith.constant 0 : i32
    return %c0_i32 : i32
  }
  func.func @transform_1(%arg0: i32) -> (i32, i32) {
    %c0_i32 = arith.constant 0 : i32
    %c0_i32_0 = arith.constant 0 : i32
    return %arg0, %c0_i32 : i32, i32
  }
  func.func @transform_2(%arg0: i32) -> (i32, i32) {
    %c0_i32 = arith.constant 0 : i32
    %c0_i32_0 = arith.constant 0 : i32
    return %arg0, %c0_i32 : i32, i32
  }
}

</mosaic_0001>

<bundles_post_ra>
// kernel: tpu_custom_call.1
= control target key start
LH: loop header
LB: loop body
LE: loop exit
PB: predicated region body
PF: predicated region fallthrough
CT: control target
= control target key end

     0   :  { %7 = vsyncpa [#allocation5], 0  ;;  %s187_s0 = inlined_call_operand.hbm [shape: f32[2], index: 0, kind: input, shape index: {}]   ;;  %s188_s1 = inlined_call_operand.hbm [shape: f32[4,512], index: 1, kind: input, shape index: {}]   ;;  %s189_s2 = inlined_call_operand.hbm [shape: f32[4,512], index: 2, kind: output, shape index: {}]  }
   0x1   :  { %8 = vsyncpa [#allocation3], 0 }
   0x2   :  { %9 = vsyncpa [#allocation4], 0  ;;  %s73_s11 = scalar_lea.hbm %s187_s0, 16 }
   0x3   :  { %p74_p0 = scmp.ne.s32.totalorder %s187_s0, %s73_s11  ;;  %p77_p1 = scmp.lt.u32.totalorder %s73_s11, %s187_s0 }
   0x5   :  { %p79_p2 = pnand %p77_p1, %p74_p0 }
   0x7   :  { %82 = shalt.err (!%p79_p2)
}
   0x8   :  { %s133_s16 = smov [#allocation2]   ;;  %s134_s19 = smov [#allocation6]  }
   0x9   :  { %17 = dma.hbm_to_smem %s187_s0, 16, %s133_s16, [#allocation5]  }
   0xa   :  { %s24_s20 = sshll.u32 %s134_s19, 4  ;;  %s83_s23 = scalar_lea.hbm %s188_s1, 256  ;;  %s25_s20 = int_to_ptr.vmem [resolvable:$true] %s24_s20 }
   0xb   :  { %p84_p3 = scmp.ne.s32.totalorder %s188_s1, %s83_s23  ;;  %p87_p4 = scmp.lt.u32.totalorder %s83_s23, %s188_s1 }
   0xd   :  { %p89_p5 = pnand %p87_p4, %p84_p3 }
   0xf   :  { %92 = shalt.err (!%p89_p5)
}
  0x10   :  { %s93_s28 = scalar_lea.vmem %s25_s20, 256  ;;  %p98_p7 = scmp.lt.s32.totalorder %s25_s20, %s25_s20 }
  0x11   :  { %p94_p6 = scmp.ne.s32.totalorder %s25_s20, %s93_s28  ;;  %p99_p8 = scmp.lt.s32.totalorder %s93_s28, %s93_s28 }
  0x13   :  { %p100_p9 = por %p99_p8, %p98_p7 }
  0x15   :  { %p101_p10 = pnand %p100_p9, %p94_p6 }
  0x17   :  { %104 = shalt.err (!%p101_p10)
}
  0x18   :  { %27 = dma.hbm_to_vmem [thread:$0]  %s188_s1, 256, %s25_s20, [#allocation3]  }
  0x19   :  { %127 = dma.done.wait [#allocation5], 16  }
  0x1a   :  { %128 = vsyncadd [#allocation5], 4294967280 }
  0x1b   :  { %129 = dma.done.wait [#allocation3], 256  }
  0x1c   :  { %130 = vsyncadd [#allocation3], 4294967040 }
  0x1d   :  { %34 = sfence }
  0x1e   :  { %s35_s30 = sld [smem:[#allocation2]]  ;;  %s69_s3 = sld [smem:[#allocation2 + $0x1]]  ;;  %v37_v0 = vld [vmem:[#allocation6] sm:$0xff]  ;;  %v38_v1 = vld [vmem:[#allocation6 + $0x8] sm:$0xff] }
  0x1f   :  { %s135_s4 = smov [#allocation7]  }
  0x20   :  { %s59_s5 = sshll.u32 %s135_s4, 4  ;;  %s60_s5 = int_to_ptr.vmem [resolvable:$true] %s59_s5 }
  0x21   :  { %s105_s1 = scalar_lea.vmem %s60_s5, 256  ;;  %p110_p12 = scmp.lt.s32.totalorder %s60_s5, %s60_s5 }
  0x22   :  { %p106_p11 = scmp.ne.s32.totalorder %s60_s5, %s105_s1  ;;  %p111_p13 = scmp.lt.s32.totalorder %s105_s1, %s105_s1 }
  0x24   :  { %v39_v2 = vstv %s35_s30  ;;  %v42_v3 = vstv %s69_s3  ;;  %p112_p0 = por %p111_p13, %p110_p12 }
  0x25   :  { %v40_v4 = vsub.f32 %v37_v0, %v39_v2  ;;  %v41_v5 = vsub.f32 %v38_v1, %v39_v2 }
  0x26   :  { %p113_p1 = pnand %p112_p0, %p106_p11 }
  0x27   :  { %v43_v6 = vmul.f32 %v42_v3, %v40_v4  ;;  %v44_v7 = vmul.f32 %v42_v3, %v41_v5 }
  0x29   :  { %v45_v8 = vmax.f32 %v43_v6, -1.0  ;;  %v46_v9 = vmax.f32 %v44_v7, -1.0 }
  0x2b   :  { %v47_v10 = vmin.f32 %v45_v8, 0.0  ;;  %v48_v11 = vmin.f32 %v46_v9, 0.0 }
  0x2d   :  { %v49_v12 = vadd.f32 1.0, %v47_v10  ;;  %v50_v13 = vadd.f32 1.0, %v48_v11 }
  0x2f   :  { %51 = vst [vmem:[#allocation7] sm:$0xff] %v49_v12  ;;  %52 = vst [vmem:[#allocation7 + $0x8] sm:$0xff] %v50_v13 }
  0x30   :  { %116 = shalt.err (!%p113_p1)
}
  0x31   :  { %s117_s8 = scalar_lea.hbm %s189_s2, 256 }
  0x32   :  { %p118_p2 = scmp.ne.s32.totalorder %s189_s2, %s117_s8  ;;  %p121_p3 = scmp.lt.u32.totalorder %s117_s8, %s189_s2 }
  0x34   :  { %p123_p4 = pnand %p121_p3, %p118_p2 }
  0x36   :  { %126 = shalt.err (!%p123_p4)
}
  0x37   :  { %62 = dma.vmem_to_hbm [thread:$0]  %s60_s5, 256, %s189_s2, [#allocation4]  }
  0x38   :  { %131 = dma.done.wait [#allocation4], 256  }
  0x39   :  { %132 = vsyncadd [#allocation4], 4294967040 }
  0x3a   :  { %66 = vsyncpa [#allocation3], 1 }
  0x3b   :  { %67 = vsyncpa [#allocation4], 1 }
  0x3c   :  { %68 = vsyncpa [#allocation5], 1 }

</bundles_post_ra>
